<compile_context>
chip_gen: v6e
topology: v6e:2x2x1
jax: 0.10.0
libtpu: 0.0.40
codegen_flags: <defaults>
</compile_context>

<pallas_src>
import functools
import math

import jax
import jax.numpy as jnp
from jax.experimental import pallas as pl
from jax.experimental.pallas import tpu as pltpu


def _row_align(itemsize):
    # Packed sublane tile: (8,128) f32, (16,128) bf16, (32,128) int8/fp8.
    return max(8, 32 // max(1, itemsize))


def _choose_tile_rows(n_rows, width, itemsize, budget_bytes):
    """Rows per tile so one (TN, width) block is ~budget_bytes.  If the whole
    slab fits in one block, use the full row count (block == full array dims is
    always a legal BlockSpec, regardless of divisibility)."""
    align = _row_align(itemsize)
    rows = budget_bytes // max(1, width * itemsize)
    rows = max(align, (rows // align) * align)
    if n_rows <= rows:
        return n_rows
    return rows


def _stats_kernel(x_ref, sum_ref, ssq_ref, *, tn, n_rows, tiles_per_split,
                  need_mask):
    """Pass 1: per-channel sum / sum-of-squares.  Each value of the leading
    ('parallel') grid axis accumulates into its own (1, 1, Ef) output row."""
    c = pl.program_id(0)
    i = pl.program_id(1)

    @pl.when(i == 0)
    def _():
        sum_ref[...] = jnp.zeros_like(sum_ref)
        ssq_ref[...] = jnp.zeros_like(ssq_ref)

    x = x_ref[...].astype(jnp.float32)                       # (TN, Ef)
    if need_mask:
        # Zero rows past the end of the slab (partial last tile and any
        # fully-out-of-range tile of the second split).
        t = c * tiles_per_split + i                          # global tile index
        valid = n_rows - t * tn                              # traced scalar
        row = jax.lax.broadcasted_iota(jnp.int32, x.shape, 0)
        x = jnp.where(row < valid, x, 0.0)
    sum_ref[...] += jnp.sum(x, axis=0, keepdims=True)[None]
    ssq_ref[...] += jnp.sum(x * x, axis=0, keepdims=True)[None]


def _apply_kernel(x_ref, p_ref, o_ref):
    """Pass 2: out = x * (alpha + sigmoid(s*x + t) * (1 - alpha))."""
    x = x_ref[...].astype(jnp.float32)                       # (TN, Ef)
    p = p_ref[...]                                           # (4, Ef) f32
    s, t = p[0:1, :], p[1:2, :]
    alpha, om_alpha = p[2:3, :], p[3:4, :]
    x_n = jax.nn.sigmoid(x * s + t)
    o_ref[...] = (x * (alpha + x_n * om_alpha)).astype(o_ref.dtype)


def dice_forward(x, alpha, beta, gamma, bn_bias, *, eps=1e-8, dim=3,
                 block_budget_bytes=4 << 20, vmem_limit_bytes=48 << 20):
    """Dice forward.  dim=3: x is (B, T, E).  dim=2: x is (B, E)."""
    if dim == 3:
        B, T, E = x.shape
        x2d = x.reshape(B * T, E)
    elif dim == 2:
        B, E = x.shape
        x2d = x
    else:
        raise ValueError("dim must be 2 or 3")

    N = x2d.shape[0]
    itemsize = jnp.dtype(x2d.dtype).itemsize

    # ---- lane folding (free, row-major reshape) -----------------------------
    fold = 128 // math.gcd(E, 128)
    k = fold if (fold > 1 and N % fold == 0) else 1
    Nf, Ef = N // k, E * k
    xf = x2d.reshape(Nf, Ef)

    TN = _choose_tile_rows(Nf, Ef, itemsize, block_budget_bytes)
    nt = pl.cdiv(Nf, TN)                       # total row tiles
    n_splits = 2 if nt >= 2 else 1             # v7x: one split per TensorCore
    ntc = pl.cdiv(nt, n_splits)                # tiles per split
    need_mask = (n_splits * ntc * TN) != Nf
    clamp = (n_splits * ntc) > nt              # rectangular grid overshoot

    def x_stats_map(c, i):
        t = c * ntc + i
        if clamp:
            t = jnp.minimum(t, nt - 1)         # stay on a valid block; masked in-kernel
        return (t, 0)

    stats_kernel = functools.partial(
        _stats_kernel, tn=TN, n_rows=Nf, tiles_per_split=ntc,
        need_mask=need_mask)

    # ---- pass 1: per-channel batch statistics (training-mode BN) -----------
    ssum, ssq = pl.pallas_call(
        stats_kernel,
        out_shape=(jax.ShapeDtypeStruct((n_splits, 1, Ef), jnp.float32),
                   jax.ShapeDtypeStruct((n_splits, 1, Ef), jnp.float32)),
        grid=(n_splits, ntc),
        in_specs=[pl.BlockSpec((TN, Ef), x_stats_map)],
        out_specs=(pl.BlockSpec((1, 1, Ef), lambda c, i: (c, 0, 0)),
                   pl.BlockSpec((1, 1, Ef), lambda c, i: (c, 0, 0))),
        compiler_params=pltpu.CompilerParams(
            dimension_semantics=("parallel", "arbitrary"),
            vmem_limit_bytes=vmem_limit_bytes),
        cost_estimate=pl.CostEstimate(
            flops=3 * Nf * Ef, transcendentals=0,
            bytes_accessed=Nf * Ef * itemsize + 2 * n_splits * Ef * 4),
    )(xf)

    # ---- finalize per-channel affine once (hoisted out of the hot loop) ----
    ssum_e = ssum.sum(axis=(0, 1)).reshape(k, E).sum(axis=0)      # (E,)
    ssq_e = ssq.sum(axis=(0, 1)).reshape(k, E).sum(axis=0)        # (E,)
    n_f = jnp.float32(N)
    mean = ssum_e / n_f
    var = jnp.maximum(ssq_e / n_f - mean * mean, 0.0)             # biased var
    inv = jax.lax.rsqrt(var + jnp.float32(eps))
    a = alpha.reshape(E).astype(jnp.float32)
    b = beta.reshape(E).astype(jnp.float32)
    g = gamma.reshape(E).astype(jnp.float32)
    cb = bn_bias.reshape(E).astype(jnp.float32)
    s = b * g * inv                                               # slope
    t = b * cb - s * mean                                         # intercept
    params = jnp.stack([s, t, a, 1.0 - a], axis=0)                # (4, E)
    if k > 1:
        params = jnp.tile(params, (1, k))                         # (4, Ef)

    # ---- pass 2: elementwise normalize + sigmoid + gate ---------------------
    outf = pl.pallas_call(
        _apply_kernel,
        out_shape=jax.ShapeDtypeStruct((Nf, Ef), x.dtype),
        grid=(nt,),
        in_specs=[pl.BlockSpec((TN, Ef), lambda i: (i, 0)),
                  pl.BlockSpec((4, Ef), lambda i: (0, 0))],
        out_specs=pl.BlockSpec((TN, Ef), lambda i: (i, 0)),
        compiler_params=pltpu.CompilerParams(
            dimension_semantics=("parallel",),
            vmem_limit_bytes=vmem_limit_bytes),
        cost_estimate=pl.CostEstimate(
            flops=6 * Nf * Ef, transcendentals=Nf * Ef,
            bytes_accessed=2 * Nf * Ef * itemsize + 4 * Ef * 4),
    )(xf, params)

    out2d = outf.reshape(N, E)
    if dim == 3:
        return out2d.reshape(B, T, E)
    return out2d


# ------------------------------ references ----------------------------------
def _dice_ref_2d(x2d, alpha, beta, gamma, bn_bias, *, eps=1e-8):
    xf = x2d.astype(jnp.float32)
    mean = jnp.mean(xf, axis=0, keepdims=True)
    var = jnp.mean((xf - mean) ** 2, axis=0, keepdims=True)
    x_hat = (xf - mean) / jnp.sqrt(var + eps)
    bn = gamma[None, :] * x_hat + bn_bias[None, :]
    x_n = jax.nn.sigmoid(beta[None, :] * bn)
    out = alpha[None, :] * (1.0 - x_n) * xf + x_n * xf
    return out.astype(x2d.dtype)


def _dice_ref_3d(x, alpha, beta, gamma, bn_bias, *, eps=1e-8):
    # Mirrors the PyTorch dim=3 path (transpose + BatchNorm1d over E).
    xt = jnp.transpose(x, (0, 2, 1)).astype(jnp.float32)          # (B, E, T)
    mean = jnp.mean(xt, axis=(0, 2), keepdims=True)
    var = jnp.mean((xt - mean) ** 2, axis=(0, 2), keepdims=True)
    x_hat = (xt - mean) / jnp.sqrt(var + eps)
    bn = gamma[None, :, None] * x_hat + bn_bias[None, :, None]
    x_n = jax.nn.sigmoid(beta[None, :, None] * bn)
    out = alpha[None, :, None] * (1.0 - x_n) * xt + x_n * xt
    return jnp.transpose(out, (0, 2, 1)).astype(x.dtype)


if __name__ == "__main__":
    eps = 1e-8
    key = jax.random.PRNGKey(0)

    def make_params(kk, E):
        ka, kb, kg, kc = jax.random.split(kk, 4)
        # Module __init__ uses zeros for alpha/beta and default BN affine
        # (gamma=1, bias=0); use small deterministic random values so the full
        # compute path is exercised.
        alpha = 0.1 * jax.random.normal(ka, (E,), dtype=jnp.float32)
        beta = 0.1 * jax.random.normal(kb, (E,), dtype=jnp.float32)
        gamma = 1.0 + 0.1 * jax.random.normal(kg, (E,), dtype=jnp.float32)
        bias = 0.1 * jax.random.normal(kc, (E,), dtype=jnp.float32)
        return alpha, beta, gamma, bias

    ok = True
    k1, k2, k3, k4, kp1, kp2, kp3, kp4 = jax.random.split(key, 8)

    # Case 1: small dim=3 shape; lane-folded (N=16, E=32 -> 4x128), single tile.
    B, T, E = 2, 8, 32
    x = jax.random.normal(k1, (B, T, E), dtype=jnp.float32)
    alpha, beta, gamma, bias = make_params(kp1, E)
    out = jax.block_until_ready(
        dice_forward(x, alpha, beta, gamma, bias, eps=eps, dim=3))
    ref = _dice_ref_3d(x, alpha, beta, gamma, bias, eps=eps)
    ok &= out.shape == (B, T, E)
    ok &= bool(jnp.allclose(out, ref, atol=1e-5, rtol=1e-5))

    # Case 2: dim=3, N=750 not divisible by the fold factor -> lane-sparse
    # fallback path (E=32 as full minor dim), single full-slab tile.
    B, T, E = 3, 250, 32
    x = jax.random.normal(k2, (B, T, E), dtype=jnp.float32)
    alpha, beta, gamma, bias = make_params(kp2, E)
    out = jax.block_until_ready(
        dice_forward(x, alpha, beta, gamma, bias, eps=eps, dim=3))
    ref = _dice_ref_3d(x, alpha, beta, gamma, bias, eps=eps)
    ok &= out.shape == (B, T, E)
    ok &= bool(jnp.allclose(out, ref, atol=1e-5, rtol=1e-5))

    # Case 3: dim=2 path (N=40, E=32 -> folded to 10x128).
    B, E = 40, 32
    x = jax.random.normal(k3, (B, E), dtype=jnp.float32)
    alpha, beta, gamma, bias = make_params(kp3, E)
    out = jax.block_until_ready(
        dice_forward(x, alpha, beta, gamma, bias, eps=eps, dim=2))
    ref = _dice_ref_2d(x, alpha, beta, gamma, bias, eps=eps)
    ok &= out.shape == (B, E)
    ok &= bool(jnp.allclose(out, ref, atol=1e-5, rtol=1e-5))

    # Case 4: force multi-tile streaming with a tiny block budget so the
    # two-way stats split, the clamped index map, and the partial-tile mask
    # are all exercised (N=1200 folded -> 300x128, TN=64, 5 tiles over 2 splits).
    B, T, E = 4, 300, 32
    x = jax.random.normal(k4, (B, T, E), dtype=jnp.float32)
    alpha, beta, gamma, bias = make_params(kp4, E)
    out = jax.block_until_ready(
        dice_forward(x, alpha, beta, gamma, bias, eps=eps, dim=3,
                     block_budget_bytes=32 << 10))
    ref = _dice_ref_3d(x, alpha, beta, gamma, bias, eps=eps)
    ok &= out.shape == (B, T, E)
    ok &= bool(jnp.allclose(out, ref, atol=1e-5, rtol=1e-5))

    assert ok, "mismatch vs reference"
    print("KERNEL_OK")
</pallas_src>

<mosaic_0001>
module attributes {stable_mosaic.version = 11 : i64} {
  func.func @_stats_kernel(%arg0: i32, %arg1: i32, %arg2: memref<4x128xf32, #tpu.memory_space<vmem>>, %arg3: memref<1x1x128xf32, #tpu.memory_space<vmem>>, %arg4: memref<1x1x128xf32, #tpu.memory_space<vmem>>) attributes {dimension_semantics = [#tpu.dimension_semantics<parallel>, #tpu.dimension_semantics<arbitrary>], iteration_bounds = array<i64: 1, 1>, scalar_prefetch = 0 : i64, scratch_operands = 0 : i64, tpu.core_type = #tpu.core_type<tc>, window_params = [{transform_indices = @transform_0, window_bounds = array<i64: 4, 128>}, {transform_indices = @transform_1, window_bounds = array<i64: 1, 1, 128>}, {transform_indices = @transform_2, window_bounds = array<i64: 1, 1, 128>}]} {
    %c0_i32 = arith.constant 0 : i32
    %0 = arith.cmpi eq, %arg1, %c0_i32 : i32
    %1 = arith.extui %0 : i1 to i32
    %c0_i32_0 = arith.constant 0 : i32
    %2 = arith.cmpi ne, %1, %c0_i32_0 : i32
    scf.if %2 {
      %cst_15 = arith.constant 0.000000e+00 : f32
      %17 = vector.broadcast %cst_15 : f32 to vector<1x1x128xf32>
      %c0_16 = arith.constant 0 : index
      %c0_17 = arith.constant 0 : index
      %c0_18 = arith.constant 0 : index
      %18 = vector.load %arg3[%c0_16, %c0_17, %c0_18] : memref<1x1x128xf32, #tpu.memory_space<vmem>>, vector<1x1x128xf32>
      tpu.vector_store %arg3[%c0_16, %c0_17, %c0_18], %17 {strides = array<i32>} : memref<1x1x128xf32, #tpu.memory_space<vmem>>, vector<1x1x128xf32>,
      %cst_19 = arith.constant 0.000000e+00 : f32
      %19 = vector.broadcast %cst_19 : f32 to vector<1x1x128xf32>
      %c0_20 = arith.constant 0 : index
      %c0_21 = arith.constant 0 : index
      %c0_22 = arith.constant 0 : index
      %20 = vector.load %arg4[%c0_20, %c0_21, %c0_22] : memref<1x1x128xf32, #tpu.memory_space<vmem>>, vector<1x1x128xf32>
      tpu.vector_store %arg4[%c0_20, %c0_21, %c0_22], %19 {strides = array<i32>} : memref<1x1x128xf32, #tpu.memory_space<vmem>>, vector<1x1x128xf32>,
    } else {
    }
    %c0 = arith.constant 0 : index
    %c0_1 = arith.constant 0 : index
    %3 = vector.load %arg2[%c0, %c0_1] : memref<4x128xf32, #tpu.memory_space<vmem>>, vector<4x128xf32>
    %c0_2 = arith.constant 0 : index
    %c0_3 = arith.constant 0 : index
    %c0_4 = arith.constant 0 : index
    %4 = vector.load %arg3[%c0_2, %c0_3, %c0_4] : memref<1x1x128xf32, #tpu.memory_space<vmem>>, vector<1x1x128xf32>
    %cst = arith.constant dense<0.000000e+00> : vector<128xf32>
    %5 = vector.multi_reduction <add>, %3, %cst [0] : vector<4x128xf32> to vector<128xf32>
    %6 = vector.shape_cast %5 : vector<128xf32> to vector<1x128xf32>
    %7 = vector.shape_cast %6 : vector<1x128xf32> to vector<1x1x128xf32>
    %8 = arith.addf %4, %7 : vector<1x1x128xf32>
    %c0_5 = arith.constant 0 : index
    %c0_6 = arith.constant 0 : index
    %c0_7 = arith.constant 0 : index
    %9 = vector.load %arg3[%c0_5, %c0_6, %c0_7] : memref<1x1x128xf32, #tpu.memory_space<vmem>>, vector<1x1x128xf32>
    tpu.vector_store %arg3[%c0_5, %c0_6, %c0_7], %8 {strides = array<i32>} : memref<1x1x128xf32, #tpu.memory_space<vmem>>, vector<1x1x128xf32>,
    %c0_8 = arith.constant 0 : index
    %c0_9 = arith.constant 0 : index
    %c0_10 = arith.constant 0 : index
    %10 = vector.load %arg4[%c0_8, %c0_9, %c0_10] : memref<1x1x128xf32, #tpu.memory_space<vmem>>, vector<1x1x128xf32>
    %11 = arith.mulf %3, %3 : vector<4x128xf32>
    %cst_11 = arith.constant dense<0.000000e+00> : vector<128xf32>
    %12 = vector.multi_reduction <add>, %11, %cst_11 [0] : vector<4x128xf32> to vector<128xf32>
    %13 = vector.shape_cast %12 : vector<128xf32> to vector<1x128xf32>
    %14 = vector.shape_cast %13 : vector<1x128xf32> to vector<1x1x128xf32>
    %15 = arith.addf %10, %14 : vector<1x1x128xf32>
    %c0_12 = arith.constant 0 : index
    %c0_13 = arith.constant 0 : index
    %c0_14 = arith.constant 0 : index
    %16 = vector.load %arg4[%c0_12, %c0_13, %c0_14] : memref<1x1x128xf32, #tpu.memory_space<vmem>>, vector<1x1x128xf32>
    tpu.vector_store %arg4[%c0_12, %c0_13, %c0_14], %15 {strides = array<i32>} : memref<1x1x128xf32, #tpu.memory_space<vmem>>, vector<1x1x128xf32>,
    return
  }
  func.func @transform_0(%arg0: i32, %arg1: i32) -> (i32, i32) {
    %c1_i32 = arith.constant 1 : i32
    %0 = arith.muli %arg0, %c1_i32 : i32
    %1 = arith.addi %0, %arg1 : i32
    %c0_i32 = arith.constant 0 : i32
    %c0_i32_0 = arith.constant 0 : i32
    return %1, %c0_i32 : i32, i32
  }
  func.func @transform_1(%arg0: i32, %arg1: i32) -> (i32, i32, i32) {
    %c0_i32 = arith.constant 0 : i32
    %c0_i32_0 = arith.constant 0 : i32
    %c0_i32_1 = arith.constant 0 : i32
    return %arg0, %c0_i32, %c0_i32_0 : i32, i32, i32
  }
  func.func @transform_2(%arg0: i32, %arg1: i32) -> (i32, i32, i32) {
    %c0_i32 = arith.constant 0 : i32
    %c0_i32_0 = arith.constant 0 : i32
    %c0_i32_1 = arith.constant 0 : i32
    return %arg0, %c0_i32, %c0_i32_0 : i32, i32, i32
  }
}

</mosaic_0001>

<bundles_post_ra>
// kernel: tpu_custom_call.1
= control target key start
LH: loop header
LB: loop body
LE: loop exit
PB: predicated region body
PF: predicated region fallthrough
CT: control target
= control target key end

     0   :  { %8 = vsyncpa [#allocation3], 0  ;;  %s184_s0 = inlined_call_operand.hbm [shape: f32[4,128], index: 0, kind: input, shape index: {}]   ;;  %s185_s1 = inlined_call_operand.hbm [shape: f32[1,1,128], index: 1, kind: output, shape index: {0}]   ;;  %s186_s2 = inlined_call_operand.hbm [shape: f32[1,1,128], index: 2, kind: output, shape index: {1}]  }
   0x1   :  { %9 = vsyncpa [#allocation4], 0 }
   0x2   :  { %10 = vsyncpa [#allocation7], 0  ;;  %s156_s9 = smov [#allocation2]  }
   0x3   :  { %s20_s10 = sshll.u32 %s156_s9, 4  ;;  %s21_s10 = int_to_ptr.vmem [resolvable:$true] %s20_s10 }
   0x4   :  { %s98_s11 = scalar_lea.vmem %s21_s10, 64  ;;  %p103_p1 = scmp.lt.s32.totalorder %s21_s10, %s21_s10 }
   0x5   :  { %p99_p0 = scmp.ne.s32.totalorder %s21_s10, %s98_s11  ;;  %p104_p2 = scmp.lt.s32.totalorder %s98_s11, %s98_s11 }
   0x7   :  { %p105_p3 = por %p104_p2, %p103_p1 }
   0x9   :  { %p106_p4 = pnand %p105_p3, %p99_p0 }
   0xb   :  { %109 = shalt.err (!%p106_p4)
}
   0xc   :  { %23 = dma.hbm_to_vmem [thread:$0]  %s184_s0, 64, %s21_s10, [#allocation3]  }
   0xd   :  { %150 = dma.done.wait [#allocation3], 64  }
   0xe   :  { %151 = vsyncadd [#allocation3], 4294967232  ;;  %v157_v0 = vmov 0.0   ;;  %vm36_vm0 = vcmask 1043456   ;;  %v34_v1 = vld [vmem:[#allocation2] sm:$0xf] }
   0xf   :  { %32 = vst [vmem:[#allocation5] sm:$0x1] %v157_v0  ;;  %33 = vst [vmem:[#allocation6] sm:$0x1] %v157_v0  ;;  %v37_v2 = vsel %vm36_vm0, %v34_v1, 0.0  ;;  %v47_v3 = vmul.f32 %v34_v1, %v34_v1  ;;  %s158_s0 = smov [#allocation5]  }
  0x10   :  { %v38_v4 = vrot.slane %v37_v2, 4  ;;  %s63_s14 = sshll.u32 %s158_s0, 4  ;;  %s159_s15 = smov [#allocation6]   ;;  %s64_s14 = int_to_ptr.vmem [resolvable:$true] %s63_s14 }
  0x11   :  { %v48_v5 = vsel %vm36_vm0, %v47_v3, 0.0  ;;  %s73_s16 = sshll.u32 %s159_s15, 4  ;;  %s110_s17 = scalar_lea.vmem %s64_s14, 16  ;;  %s74_s16 = int_to_ptr.vmem [resolvable:$true] %s73_s16 }
  0x12   :  { %v39_v6 = vadd.f32 %v38_v4, %v37_v2  ;;  %v49_v7 = vrot.slane %v48_v5, 4  ;;  %p111_p5 = scmp.ne.s32.totalorder %s64_s14, %s110_s17  ;;  %s114_s18 = scalar_lea.vmem %s64_s14, 32 }
  0x13   :  { %p115_p6 = scmp.lt.s32.totalorder %s64_s14, %s64_s14  ;;  %p116_p7 = scmp.lt.s32.totalorder %s114_s18, %s110_s17 }
  0x14   :  { %v40_v8 = vrot.slane %v39_v6, 2  ;;  %v50_v9 = vadd.f32 %v49_v7, %v48_v5 }
  0x15   :  { %p117_p8 = por %p116_p7, %p115_p6 }
  0x16   :  { %v41_v10 = vadd.f32 %v40_v8, %v39_v6  ;;  %v51_v11 = vrot.slane %v50_v9, 2  ;;  %v35_v14 = vld [vmem:[#allocation5] sm:$0x1]  ;;  %v46_v17 = vld [vmem:[#allocation6] sm:$0x1] }
  0x17   :  { %p118_p9 = pnand %p117_p8, %p111_p5 }
  0x18   :  { %v42_v12 = vrot.slane %v41_v10, 1  ;;  %v52_v13 = vadd.f32 %v51_v11, %v50_v9 }
  0x1a   :  { %v43_v15 = vadd.f32 %v42_v12, %v41_v10  ;;  %v53_v16 = vrot.slane %v52_v13, 1 }
  0x1c   :  { %v44_v18 = vadd.f32 %v43_v15, %v35_v14  ;;  %v54_v19 = vadd.f32 %v53_v16, %v52_v13 }
  0x1e   :  { %45 = vst [vmem:[#allocation5] sm:$0x1] %v44_v18  ;;  %v55_v20 = vadd.f32 %v54_v19, %v46_v17 }
  0x1f   :  { %121 = shalt.err (!%p118_p9)
}
  0x20   :  { %66 = dma.vmem_to_hbm [thread:$0]  %s64_s14, 16, %s185_s1, [#allocation4]   ;;  %56 = vst [vmem:[#allocation6] sm:$0x1] %v55_v20 }
  0x21   :  { %s130_s21 = scalar_lea.vmem %s74_s16, 16  ;;  %s134_s22 = scalar_lea.vmem %s74_s16, 32 }
  0x22   :  { %p131_p10 = scmp.ne.s32.totalorder %s74_s16, %s130_s21  ;;  %p135_p11 = scmp.lt.s32.totalorder %s74_s16, %s74_s16 }
  0x23   :  { %p136_p12 = scmp.lt.s32.totalorder %s134_s22, %s130_s21 }
  0x25   :  { %p137_p13 = por %p136_p12, %p135_p11 }
  0x27   :  { %p138_p0 = pnand %p137_p13, %p131_p10 }
  0x29   :  { %141 = shalt.err (!%p138_p0)
}
  0x2a   :  { %76 = dma.vmem_to_hbm [thread:$0]  %s74_s16, 16, %s186_s2, [#allocation7]  }
  0x2b   :  { %152 = dma.done.wait [#allocation4], 16  }
  0x2c   :  { %153 = vsyncadd [#allocation4], 4294967280 }
  0x2d   :  { %154 = dma.done.wait [#allocation7], 16  }
  0x2e   :  { %155 = vsyncadd [#allocation7], 4294967280 }
  0x2f   :  { %83 = vsyncpa [#allocation3], 1 }
  0x30   :  { %84 = vsyncpa [#allocation4], 1 }
  0x31   :  { %85 = vsyncpa [#allocation7], 1 }

</bundles_post_ra>
